<compile_context>
chip_gen: v6e
topology: v6e:2x2x1
jax: 0.10.0
libtpu: 0.0.40
codegen_flags: <defaults>
</compile_context>

<pallas_src>
import jax
import jax.numpy as jnp
from jax.experimental import pallas as pl
from jax.experimental.pallas import tpu as pltpu


def lstm_kernel(x_ref, wxT_ref, whT_ref, b_ref, wpT_ref, bp_ref, out_ref):
    B, S = x_ref.shape
    H4 = whT_ref.shape[1]          # fused gate width = 4 * num_hidden
    H = H4 // 4

    whT = whT_ref[...]             # (H, 4H)

    # ---- Hoisted input projection (off the sequential critical path) --------
    # input_dim == 1  =>  x_t @ WxT == x[:, t, None] * wx_row.  Build the whole
    # (S, B, 4H) slab (bias folded in) once; per step we only do a free
    # leading-axis index.
    xT = x_ref[...].T                                       # (S, B)
    x_proj = (xT[:, :, None] * wxT_ref[...][None, :, :]
              + b_ref[...][None, :, :])                     # (S, B, 4H)

    h = jnp.zeros((B, H), jnp.float32)
    c = jnp.zeros((B, H), jnp.float32)

    # ---- Fully unrolled recurrence (S is static and small) ------------------
    for t in range(S):
        z = x_proj[t] + jnp.dot(h, whT, preferred_element_type=jnp.float32)  # (B, 4H)
        # Two full-vreg EUP launches instead of four quarter-vreg ones.
        # Fused lane order along the 4H axis is [g, i, f, o].
        zt = jnp.tanh(z)
        zs = jax.nn.sigmoid(z)
        g = zt[:, 0:H]
        i = zs[:, H:2 * H]
        f = zs[:, 2 * H:3 * H]
        o = zs[:, 3 * H:4 * H]
        c = g * i + c * f
        h = jnp.tanh(c) * o

    # ---- Epilogue: final linear layer + softmax (lane-dense, padded classes) -
    # Padded class columns have weight 0 and bias -1e30, so their logits
    # underflow to 0 after exp and do not perturb the softmax denominator.
    p = jnp.dot(h, wpT_ref[...], preferred_element_type=jnp.float32) + bp_ref[...]
    p = p - jnp.max(p, axis=-1, keepdims=True)
    e = jnp.exp(p)
    # Exact reciprocal to preserve the 1e-5 reference check; approx=True (EUP
    # vrcp) is the remaining one-shot micro-opt if the tolerance is relaxed.
    inv = pl.reciprocal(jnp.sum(e, axis=-1, keepdims=True))
    out_ref[...] = e * inv


def lstm_forward(x, wxT, whT, b, wpT, bp):
    B = x.shape[0]
    H = whT.shape[0]
    C = wpT.shape[1]
    CP = ((C + 127) // 128) * 128                     # lane-dense class axis

    # Layout plumbing (not compute hoisting): pad the classifier to 128 lanes so
    # the in-kernel output store is an unmasked full-lane vst.
    wpT_pad = jnp.zeros((H, CP), jnp.float32).at[:, :C].set(wpT)
    bp_pad = jnp.full((1, CP), -1e30, jnp.float32).at[:, :C].set(bp)

    out_pad = pl.pallas_call(
        lstm_kernel,
        out_shape=jax.ShapeDtypeStruct((B, CP), jnp.float32),
        in_specs=[pl.BlockSpec(memory_space=pltpu.MemorySpace.VMEM)] * 6,
        out_specs=pl.BlockSpec(memory_space=pltpu.MemorySpace.VMEM),
    )(x, wxT, whT, b, wpT_pad, bp_pad)
    return out_pad[:, :C]


def init_params(key, input_dim, num_hidden, num_classes):
    """Deterministic synthetic parameters, same shapes as the PyTorch module."""
    ks = jax.random.split(key, 14)
    n = lambda k, shape: (0.1 * jax.random.normal(k, shape)).astype(jnp.float32)
    w_gx, w_ix, w_fx, w_ox = (n(ks[i], (num_hidden, input_dim)) for i in range(4))
    w_gh, w_ih, w_fh, w_oh = (n(ks[4 + i], (num_hidden, num_hidden)) for i in range(4))
    b_g, b_i, b_f, b_o = (n(ks[8 + i], (num_hidden, 1)) for i in range(4))
    w_ph = n(ks[12], (num_classes, num_hidden))
    bias_p = n(ks[13], (num_classes, 1))

    # Fuse gates in order [g, i, f, o] and pre-transpose for the x_t @ W^T form.
    wxT = jnp.concatenate([w_gx, w_ix, w_fx, w_ox], axis=0).T   # (input_dim, 4H)
    whT = jnp.concatenate([w_gh, w_ih, w_fh, w_oh], axis=0).T   # (H, 4H)
    b = jnp.concatenate([b_g, b_i, b_f, b_o], axis=0).T         # (1, 4H)
    wpT = w_ph.T                                                # (H, C)
    bp = bias_p.T                                               # (1, C)
    return wxT, whT, b, wpT, bp


def reference_forward(x, wxT, whT, b, wpT, bp):
    """Pure-JAX mirror of the PyTorch forward for a sanity check."""
    B, S = x.shape
    H = whT.shape[0]
    h = jnp.zeros((B, H), jnp.float32)
    c = jnp.zeros((B, H), jnp.float32)
    for t in range(S):
        x_t = x[:, t:t + 1]
        z = x_t @ wxT + h @ whT + b
        g = jnp.tanh(z[:, 0:H])
        i = jax.nn.sigmoid(z[:, H:2 * H])
        f = jax.nn.sigmoid(z[:, 2 * H:3 * H])
        o = jax.nn.sigmoid(z[:, 3 * H:4 * H])
        c = g * i + c * f
        h = jnp.tanh(c) * o
    p = h @ wpT + bp
    return jax.nn.softmax(p, axis=-1)


if __name__ == "__main__":
    seq_length = 8
    input_dim = 1
    num_hidden = 32
    num_classes = 10
    batch_size = 8

    key = jax.random.PRNGKey(0)
    k_x, k_p = jax.random.split(key)
    x = jax.random.normal(k_x, (batch_size, seq_length), dtype=jnp.float32)
    wxT, whT, b, wpT, bp = init_params(k_p, input_dim, num_hidden, num_classes)

    out = lstm_forward(x, wxT, whT, b, wpT, bp)
    out = jax.block_until_ready(out)

    ref = reference_forward(x, wxT, whT, b, wpT, bp)
    assert out.shape == (batch_size, num_classes)
    assert jnp.allclose(out, ref, atol=1e-5, rtol=1e-5)

    print("KERNEL_OK")
</pallas_src>

<mosaic_0001>
module attributes {stable_mosaic.version = 11 : i64} {
  func.func @lstm_kernel(%arg0: memref<8x8xf32, #tpu.memory_space<vmem>>, %arg1: memref<1x128xf32, #tpu.memory_space<vmem>>, %arg2: memref<32x128xf32, #tpu.memory_space<vmem>>, %arg3: memref<1x128xf32, #tpu.memory_space<vmem>>, %arg4: memref<32x128xf32, #tpu.memory_space<vmem>>, %arg5: memref<1x128xf32, #tpu.memory_space<vmem>>, %arg6: memref<8x128xf32, #tpu.memory_space<vmem>>) attributes {dimension_semantics = [], scalar_prefetch = 0 : i64, scratch_operands = 0 : i64, tpu.core_type = #tpu.core_type<tc>} {
    %c0 = arith.constant 0 : index
    %c0_0 = arith.constant 0 : index
    %0 = vector.load %arg2[%c0, %c0_0] : memref<32x128xf32, #tpu.memory_space<vmem>>, vector<32x128xf32>
    %c0_1 = arith.constant 0 : index
    %c0_2 = arith.constant 0 : index
    %1 = vector.load %arg0[%c0_1, %c0_2] : memref<8x8xf32, #tpu.memory_space<vmem>>, vector<8x8xf32>
    %2 = tpu.transpose %1, [1, 0] : vector<8x8xf32> -> vector<8x8xf32>
    %3 = vector.shape_cast %2 : vector<8x8xf32> to vector<8x8x1xf32>
    %c0_3 = arith.constant 0 : index
    %c0_4 = arith.constant 0 : index
    %4 = vector.load %arg1[%c0_3, %c0_4] : memref<1x128xf32, #tpu.memory_space<vmem>>, vector<1x128xf32>
    %5 = vector.shape_cast %4 : vector<1x128xf32> to vector<1x1x128xf32>
    %6 = vector.broadcast %3 : vector<8x8x1xf32> to vector<8x8x128xf32>
    %7 = vector.broadcast %5 : vector<1x1x128xf32> to vector<8x8x128xf32>
    %8 = arith.mulf %6, %7 : vector<8x8x128xf32>
    %c0_5 = arith.constant 0 : index
    %c0_6 = arith.constant 0 : index
    %9 = vector.load %arg3[%c0_5, %c0_6] : memref<1x128xf32, #tpu.memory_space<vmem>>, vector<1x128xf32>
    %10 = vector.shape_cast %9 : vector<1x128xf32> to vector<1x1x128xf32>
    %11 = vector.broadcast %10 : vector<1x1x128xf32> to vector<8x8x128xf32>
    %12 = arith.addf %8, %11 : vector<8x8x128xf32>
    %cst = arith.constant 0.000000e+00 : f32
    %13 = vector.broadcast %cst : f32 to vector<8x32xf32>
    %cst_7 = arith.constant 0.000000e+00 : f32
    %14 = vector.broadcast %cst_7 : f32 to vector<8x32xf32>
    %15 = vector.extract_strided_slice %12 {offsets = [0, 0, 0], sizes = [1, 8, 128], strides = [1, 1, 1]} : vector<8x8x128xf32> to vector<1x8x128xf32>
    %16 = vector.shape_cast %15 : vector<1x8x128xf32> to vector<8x128xf32>
    %cst_8 = arith.constant dense<0.000000e+00> : vector<8x128xf32>
    %17 = tpu.matmul %13, %0, %cst_8 {dimension_numbers = #tpu.dot_dimension_numbers<[1], [0], [0], [1], [0, 0, 1, 1], [], []>} : vector<8x32xf32>, vector<32x128xf32>, vector<8x128xf32> -> vector<8x128xf32>
    %18 = arith.addf %16, %17 : vector<8x128xf32>
    %19 = math.tanh %18 : vector<8x128xf32>
    %20 = arith.negf %18 : vector<8x128xf32>
    %21 = math.exp %20 : vector<8x128xf32>
    %cst_9 = arith.constant 1.000000e+00 : f32
    %22 = vector.broadcast %cst_9 : f32 to vector<8x128xf32>
    %23 = arith.addf %22, %21 : vector<8x128xf32>
    %24 = arith.divf %22, %23 : vector<8x128xf32>
    %25 = vector.extract_strided_slice %19 {offsets = [0, 0], sizes = [8, 32], strides = [1, 1]} : vector<8x128xf32> to vector<8x32xf32>
    %26 = vector.extract_strided_slice %24 {offsets = [0, 32], sizes = [8, 32], strides = [1, 1]} : vector<8x128xf32> to vector<8x32xf32>
    %27 = vector.extract_strided_slice %24 {offsets = [0, 64], sizes = [8, 32], strides = [1, 1]} : vector<8x128xf32> to vector<8x32xf32>
    %28 = vector.extract_strided_slice %24 {offsets = [0, 96], sizes = [8, 32], strides = [1, 1]} : vector<8x128xf32> to vector<8x32xf32>
    %29 = arith.mulf %25, %26 : vector<8x32xf32>
    %30 = arith.mulf %14, %27 : vector<8x32xf32>
    %31 = arith.addf %29, %30 : vector<8x32xf32>
    %32 = math.tanh %31 : vector<8x32xf32>
    %33 = arith.mulf %32, %28 : vector<8x32xf32>
    %34 = vector.extract_strided_slice %12 {offsets = [1, 0, 0], sizes = [1, 8, 128], strides = [1, 1, 1]} : vector<8x8x128xf32> to vector<1x8x128xf32>
    %35 = vector.shape_cast %34 : vector<1x8x128xf32> to vector<8x128xf32>
    %cst_10 = arith.constant dense<0.000000e+00> : vector<8x128xf32>
    %36 = tpu.matmul %33, %0, %cst_10 {dimension_numbers = #tpu.dot_dimension_numbers<[1], [0], [0], [1], [0, 0, 1, 1], [], []>} : vector<8x32xf32>, vector<32x128xf32>, vector<8x128xf32> -> vector<8x128xf32>
    %37 = arith.addf %35, %36 : vector<8x128xf32>
    %38 = math.tanh %37 : vector<8x128xf32>
    %39 = arith.negf %37 : vector<8x128xf32>
    %40 = math.exp %39 : vector<8x128xf32>
    %cst_11 = arith.constant 1.000000e+00 : f32
    %41 = vector.broadcast %cst_11 : f32 to vector<8x128xf32>
    %42 = arith.addf %41, %40 : vector<8x128xf32>
    %43 = arith.divf %41, %42 : vector<8x128xf32>
    %44 = vector.extract_strided_slice %38 {offsets = [0, 0], sizes = [8, 32], strides = [1, 1]} : vector<8x128xf32> to vector<8x32xf32>
    %45 = vector.extract_strided_slice %43 {offsets = [0, 32], sizes = [8, 32], strides = [1, 1]} : vector<8x128xf32> to vector<8x32xf32>
    %46 = vector.extract_strided_slice %43 {offsets = [0, 64], sizes = [8, 32], strides = [1, 1]} : vector<8x128xf32> to vector<8x32xf32>
    %47 = vector.extract_strided_slice %43 {offsets = [0, 96], sizes = [8, 32], strides = [1, 1]} : vector<8x128xf32> to vector<8x32xf32>
    %48 = arith.mulf %44, %45 : vector<8x32xf32>
    %49 = arith.mulf %31, %46 : vector<8x32xf32>
    %50 = arith.addf %48, %49 : vector<8x32xf32>
    %51 = math.tanh %50 : vector<8x32xf32>
    %52 = arith.mulf %51, %47 : vector<8x32xf32>
    %53 = vector.extract_strided_slice %12 {offsets = [2, 0, 0], sizes = [1, 8, 128], strides = [1, 1, 1]} : vector<8x8x128xf32> to vector<1x8x128xf32>
    %54 = vector.shape_cast %53 : vector<1x8x128xf32> to vector<8x128xf32>
    %cst_12 = arith.constant dense<0.000000e+00> : vector<8x128xf32>
    %55 = tpu.matmul %52, %0, %cst_12 {dimension_numbers = #tpu.dot_dimension_numbers<[1], [0], [0], [1], [0, 0, 1, 1], [], []>} : vector<8x32xf32>, vector<32x128xf32>, vector<8x128xf32> -> vector<8x128xf32>
    %56 = arith.addf %54, %55 : vector<8x128xf32>
    %57 = math.tanh %56 : vector<8x128xf32>
    %58 = arith.negf %56 : vector<8x128xf32>
    %59 = math.exp %58 : vector<8x128xf32>
    %cst_13 = arith.constant 1.000000e+00 : f32
    %60 = vector.broadcast %cst_13 : f32 to vector<8x128xf32>
    %61 = arith.addf %60, %59 : vector<8x128xf32>
    %62 = arith.divf %60, %61 : vector<8x128xf32>
    %63 = vector.extract_strided_slice %57 {offsets = [0, 0], sizes = [8, 32], strides = [1, 1]} : vector<8x128xf32> to vector<8x32xf32>
    %64 = vector.extract_strided_slice %62 {offsets = [0, 32], sizes = [8, 32], strides = [1, 1]} : vector<8x128xf32> to vector<8x32xf32>
    %65 = vector.extract_strided_slice %62 {offsets = [0, 64], sizes = [8, 32], strides = [1, 1]} : vector<8x128xf32> to vector<8x32xf32>
    %66 = vector.extract_strided_slice %62 {offsets = [0, 96], sizes = [8, 32], strides = [1, 1]} : vector<8x128xf32> to vector<8x32xf32>
    %67 = arith.mulf %63, %64 : vector<8x32xf32>
    %68 = arith.mulf %50, %65 : vector<8x32xf32>
    %69 = arith.addf %67, %68 : vector<8x32xf32>
    %70 = math.tanh %69 : vector<8x32xf32>
    %71 = arith.mulf %70, %66 : vector<8x32xf32>
    %72 = vector.extract_strided_slice %12 {offsets = [3, 0, 0], sizes = [1, 8, 128], strides = [1, 1, 1]} : vector<8x8x128xf32> to vector<1x8x128xf32>
    %73 = vector.shape_cast %72 : vector<1x8x128xf32> to vector<8x128xf32>
    %cst_14 = arith.constant dense<0.000000e+00> : vector<8x128xf32>
    %74 = tpu.matmul %71, %0, %cst_14 {dimension_numbers = #tpu.dot_dimension_numbers<[1], [0], [0], [1], [0, 0, 1, 1], [], []>} : vector<8x32xf32>, vector<32x128xf32>, vector<8x128xf32> -> vector<8x128xf32>
    %75 = arith.addf %73, %74 : vector<8x128xf32>
    %76 = math.tanh %75 : vector<8x128xf32>
    %77 = arith.negf %75 : vector<8x128xf32>
    %78 = math.exp %77 : vector<8x128xf32>
    %cst_15 = arith.constant 1.000000e+00 : f32
    %79 = vector.broadcast %cst_15 : f32 to vector<8x128xf32>
    %80 = arith.addf %79, %78 : vector<8x128xf32>
    %81 = arith.divf %79, %80 : vector<8x128xf32>
    %82 = vector.extract_strided_slice %76 {offsets = [0, 0], sizes = [8, 32], strides = [1, 1]} : vector<8x128xf32> to vector<8x32xf32>
    %83 = vector.extract_strided_slice %81 {offsets = [0, 32], sizes = [8, 32], strides = [1, 1]} : vector<8x128xf32> to vector<8x32xf32>
    %84 = vector.extract_strided_slice %81 {offsets = [0, 64], sizes = [8, 32], strides = [1, 1]} : vector<8x128xf32> to vector<8x32xf32>
    %85 = vector.extract_strided_slice %81 {offsets = [0, 96], sizes = [8, 32], strides = [1, 1]} : vector<8x128xf32> to vector<8x32xf32>
    %86 = arith.mulf %82, %83 : vector<8x32xf32>
    %87 = arith.mulf %69, %84 : vector<8x32xf32>
    %88 = arith.addf %86, %87 : vector<8x32xf32>
    %89 = math.tanh %88 : vector<8x32xf32>
    %90 = arith.mulf %89, %85 : vector<8x32xf32>
    %91 = vector.extract_strided_slice %12 {offsets = [4, 0, 0], sizes = [1, 8, 128], strides = [1, 1, 1]} : vector<8x8x128xf32> to vector<1x8x128xf32>
    %92 = vector.shape_cast %91 : vector<1x8x128xf32> to vector<8x128xf32>
    %cst_16 = arith.constant dense<0.000000e+00> : vector<8x128xf32>
    %93 = tpu.matmul %90, %0, %cst_16 {dimension_numbers = #tpu.dot_dimension_numbers<[1], [0], [0], [1], [0, 0, 1, 1], [], []>} : vector<8x32xf32>, vector<32x128xf32>, vector<8x128xf32> -> vector<8x128xf32>
    %94 = arith.addf %92, %93 : vector<8x128xf32>
    %95 = math.tanh %94 : vector<8x128xf32>
    %96 = arith.negf %94 : vector<8x128xf32>
    %97 = math.exp %96 : vector<8x128xf32>
    %cst_17 = arith.constant 1.000000e+00 : f32
    %98 = vector.broadcast %cst_17 : f32 to vector<8x128xf32>
    %99 = arith.addf %98, %97 : vector<8x128xf32>
    %100 = arith.divf %98, %99 : vector<8x128xf32>
    %101 = vector.extract_strided_slice %95 {offsets = [0, 0], sizes = [8, 32], strides = [1, 1]} : vector<8x128xf32> to vector<8x32xf32>
    %102 = vector.extract_strided_slice %100 {offsets = [0, 32], sizes = [8, 32], strides = [1, 1]} : vector<8x128xf32> to vector<8x32xf32>
    %103 = vector.extract_strided_slice %100 {offsets = [0, 64], sizes = [8, 32], strides = [1, 1]} : vector<8x128xf32> to vector<8x32xf32>
    %104 = vector.extract_strided_slice %100 {offsets = [0, 96], sizes = [8, 32], strides = [1, 1]} : vector<8x128xf32> to vector<8x32xf32>
    %105 = arith.mulf %101, %102 : vector<8x32xf32>
    %106 = arith.mulf %88, %103 : vector<8x32xf32>
    %107 = arith.addf %105, %106 : vector<8x32xf32>
    %108 = math.tanh %107 : vector<8x32xf32>
    %109 = arith.mulf %108, %104 : vector<8x32xf32>
    %110 = vector.extract_strided_slice %12 {offsets = [5, 0, 0], sizes = [1, 8, 128], strides = [1, 1, 1]} : vector<8x8x128xf32> to vector<1x8x128xf32>
    %111 = vector.shape_cast %110 : vector<1x8x128xf32> to vector<8x128xf32>
    %cst_18 = arith.constant dense<0.000000e+00> : vector<8x128xf32>
    %112 = tpu.matmul %109, %0, %cst_18 {dimension_numbers = #tpu.dot_dimension_numbers<[1], [0], [0], [1], [0, 0, 1, 1], [], []>} : vector<8x32xf32>, vector<32x128xf32>, vector<8x128xf32> -> vector<8x128xf32>
    %113 = arith.addf %111, %112 : vector<8x128xf32>
    %114 = math.tanh %113 : vector<8x128xf32>
    %115 = arith.negf %113 : vector<8x128xf32>
    %116 = math.exp %115 : vector<8x128xf32>
    %cst_19 = arith.constant 1.000000e+00 : f32
    %117 = vector.broadcast %cst_19 : f32 to vector<8x128xf32>
    %118 = arith.addf %117, %116 : vector<8x128xf32>
    %119 = arith.divf %117, %118 : vector<8x128xf32>
    %120 = vector.extract_strided_slice %114 {offsets = [0, 0], sizes = [8, 32], strides = [1, 1]} : vector<8x128xf32> to vector<8x32xf32>
    %121 = vector.extract_strided_slice %119 {offsets = [0, 32], sizes = [8, 32], strides = [1, 1]} : vector<8x128xf32> to vector<8x32xf32>
    %122 = vector.extract_strided_slice %119 {offsets = [0, 64], sizes = [8, 32], strides = [1, 1]} : vector<8x128xf32> to vector<8x32xf32>
    %123 = vector.extract_strided_slice %119 {offsets = [0, 96], sizes = [8, 32], strides = [1, 1]} : vector<8x128xf32> to vector<8x32xf32>
    %124 = arith.mulf %120, %121 : vector<8x32xf32>
    %125 = arith.mulf %107, %122 : vector<8x32xf32>
    %126 = arith.addf %124, %125 : vector<8x32xf32>
    %127 = math.tanh %126 : vector<8x32xf32>
    %128 = arith.mulf %127, %123 : vector<8x32xf32>
    %129 = vector.extract_strided_slice %12 {offsets = [6, 0, 0], sizes = [1, 8, 128], strides = [1, 1, 1]} : vector<8x8x128xf32> to vector<1x8x128xf32>
    %130 = vector.shape_cast %129 : vector<1x8x128xf32> to vector<8x128xf32>
    %cst_20 = arith.constant dense<0.000000e+00> : vector<8x128xf32>
    %131 = tpu.matmul %128, %0, %cst_20 {dimension_numbers = #tpu.dot_dimension_numbers<[1], [0], [0], [1], [0, 0, 1, 1], [], []>} : vector<8x32xf32>, vector<32x128xf32>, vector<8x128xf32> -> vector<8x128xf32>
    %132 = arith.addf %130, %131 : vector<8x128xf32>
    %133 = math.tanh %132 : vector<8x128xf32>
    %134 = arith.negf %132 : vector<8x128xf32>
    %135 = math.exp %134 : vector<8x128xf32>
    %cst_21 = arith.constant 1.000000e+00 : f32
    %136 = vector.broadcast %cst_21 : f32 to vector<8x128xf32>
    %137 = arith.addf %136, %135 : vector<8x128xf32>
    %138 = arith.divf %136, %137 : vector<8x128xf32>
    %139 = vector.extract_strided_slice %133 {offsets = [0, 0], sizes = [8, 32], strides = [1, 1]} : vector<8x128xf32> to vector<8x32xf32>
    %140 = vector.extract_strided_slice %138 {offsets = [0, 32], sizes = [8, 32], strides = [1, 1]} : vector<8x128xf32> to vector<8x32xf32>
    %141 = vector.extract_strided_slice %138 {offsets = [0, 64], sizes = [8, 32], strides = [1, 1]} : vector<8x128xf32> to vector<8x32xf32>
    %142 = vector.extract_strided_slice %138 {offsets = [0, 96], sizes = [8, 32], strides = [1, 1]} : vector<8x128xf32> to vector<8x32xf32>
    %143 = arith.mulf %139, %140 : vector<8x32xf32>
    %144 = arith.mulf %126, %141 : vector<8x32xf32>
    %145 = arith.addf %143, %144 : vector<8x32xf32>
    %146 = math.tanh %145 : vector<8x32xf32>
    %147 = arith.mulf %146, %142 : vector<8x32xf32>
    %148 = vector.extract_strided_slice %12 {offsets = [7, 0, 0], sizes = [1, 8, 128], strides = [1, 1, 1]} : vector<8x8x128xf32> to vector<1x8x128xf32>
    %149 = vector.shape_cast %148 : vector<1x8x128xf32> to vector<8x128xf32>
    %cst_22 = arith.constant dense<0.000000e+00> : vector<8x128xf32>
    %150 = tpu.matmul %147, %0, %cst_22 {dimension_numbers = #tpu.dot_dimension_numbers<[1], [0], [0], [1], [0, 0, 1, 1], [], []>} : vector<8x32xf32>, vector<32x128xf32>, vector<8x128xf32> -> vector<8x128xf32>
    %151 = arith.addf %149, %150 : vector<8x128xf32>
    %152 = math.tanh %151 : vector<8x128xf32>
    %153 = arith.negf %151 : vector<8x128xf32>
    %154 = math.exp %153 : vector<8x128xf32>
    %cst_23 = arith.constant 1.000000e+00 : f32
    %155 = vector.broadcast %cst_23 : f32 to vector<8x128xf32>
    %156 = arith.addf %155, %154 : vector<8x128xf32>
    %157 = arith.divf %155, %156 : vector<8x128xf32>
    %158 = vector.extract_strided_slice %152 {offsets = [0, 0], sizes = [8, 32], strides = [1, 1]} : vector<8x128xf32> to vector<8x32xf32>
    %159 = vector.extract_strided_slice %157 {offsets = [0, 32], sizes = [8, 32], strides = [1, 1]} : vector<8x128xf32> to vector<8x32xf32>
    %160 = vector.extract_strided_slice %157 {offsets = [0, 64], sizes = [8, 32], strides = [1, 1]} : vector<8x128xf32> to vector<8x32xf32>
    %161 = vector.extract_strided_slice %157 {offsets = [0, 96], sizes = [8, 32], strides = [1, 1]} : vector<8x128xf32> to vector<8x32xf32>
    %162 = arith.mulf %158, %159 : vector<8x32xf32>
    %163 = arith.mulf %145, %160 : vector<8x32xf32>
    %164 = arith.addf %162, %163 : vector<8x32xf32>
    %165 = math.tanh %164 : vector<8x32xf32>
    %166 = arith.mulf %165, %161 : vector<8x32xf32>
    %c0_24 = arith.constant 0 : index
    %c0_25 = arith.constant 0 : index
    %167 = vector.load %arg4[%c0_24, %c0_25] : memref<32x128xf32, #tpu.memory_space<vmem>>, vector<32x128xf32>
    %cst_26 = arith.constant dense<0.000000e+00> : vector<8x128xf32>
    %168 = tpu.matmul %166, %167, %cst_26 {dimension_numbers = #tpu.dot_dimension_numbers<[1], [0], [0], [1], [0, 0, 1, 1], [], []>} : vector<8x32xf32>, vector<32x128xf32>, vector<8x128xf32> -> vector<8x128xf32>
    %c0_27 = arith.constant 0 : index
    %c0_28 = arith.constant 0 : index
    %169 = vector.load %arg5[%c0_27, %c0_28] : memref<1x128xf32, #tpu.memory_space<vmem>>, vector<1x128xf32>
    %170 = vector.broadcast %169 : vector<1x128xf32> to vector<8x128xf32>
    %171 = arith.addf %168, %170 : vector<8x128xf32>
    %cst_29 = arith.constant dense<0xFF800000> : vector<8xf32>
    %172 = vector.multi_reduction <maximumf>, %171, %cst_29 [1] : vector<8x128xf32> to vector<8xf32>
    %173 = vector.shape_cast %172 : vector<8xf32> to vector<8x1xf32>
    %174 = vector.broadcast %173 : vector<8x1xf32> to vector<8x128xf32>
    %175 = arith.subf %171, %174 : vector<8x128xf32>
    %176 = math.exp %175 : vector<8x128xf32>
    %cst_30 = arith.constant dense<0.000000e+00> : vector<8xf32>
    %177 = vector.multi_reduction <add>, %176, %cst_30 [1] : vector<8x128xf32> to vector<8xf32>
    %178 = vector.shape_cast %177 : vector<8xf32> to vector<8x1xf32>
    %179 = tpu.reciprocal %178 : vector<8x1xf32> -> vector<8x1xf32>
    %180 = vector.broadcast %179 : vector<8x1xf32> to vector<8x128xf32>
    %181 = arith.mulf %176, %180 : vector<8x128xf32>
    %c0_31 = arith.constant 0 : index
    %c0_32 = arith.constant 0 : index
    %182 = vector.load %arg6[%c0_31, %c0_32] : memref<8x128xf32, #tpu.memory_space<vmem>>, vector<8x128xf32>
    tpu.vector_store %arg6[%c0_31, %c0_32], %181 {strides = array<i32>} : memref<8x128xf32, #tpu.memory_space<vmem>>, vector<8x128xf32>,
    return
  }
}

</mosaic_0001>

<bundles_post_ra>
// kernel: tpu_custom_call.1
= control target key start
LH: loop header
LB: loop body
LE: loop exit
PB: predicated region body
PF: predicated region fallthrough
CT: control target
= control target key end

     0   :  { %11 = vsyncpa [#allocation3], 0  ;;  %s1628_s0 = inlined_call_operand.hbm [shape: f32[8,8], index: 0, kind: input, shape index: {}]   ;;  %s1629_s1 = inlined_call_operand.vmem [shape: f32[1,128], index: 1, kind: input, shape index: {}]   ;;  %s1630_s2 = inlined_call_operand.hbm [shape: f32[32,128], index: 2, kind: input, shape index: {}]   ;;  %s1631_s3 = inlined_call_operand.vmem [shape: f32[1,128], index: 3, kind: input, shape index: {}]   ;;  %s1632_s4 = inlined_call_operand.hbm [shape: f32[32,128], index: 4, kind: input, shape index: {}]   ;;  %s1633_s5 = inlined_call_operand.vmem [shape: f32[1,128], index: 5, kind: input, shape index: {}]   ;;  %s1634_s6 = inlined_call_operand.hbm [shape: f32[8,128], index: 6, kind: output, shape index: {}]  }
   0x1   :  { %12 = vsyncpa [#allocation6], 0 }
   0x2   :  { %13 = vsyncpa [#allocation4], 0  ;;  %s1394_s21 = smov [#allocation5]  }
   0x3   :  { %s31_s22 = sshll.u32 %s1394_s21, 4  ;;  %s32_s22 = int_to_ptr.vmem [resolvable:$true] %s31_s22 }
   0x4   :  { %s1316_s23 = scalar_lea.vmem %s32_s22, 512  ;;  %p1321_p1 = scmp.lt.s32.totalorder %s32_s22, %s32_s22 }
   0x5   :  { %p1317_p0 = scmp.ne.s32.totalorder %s32_s22, %s1316_s23  ;;  %p1322_p2 = scmp.lt.s32.totalorder %s1316_s23, %s1316_s23 }
   0x7   :  { %p1323_p3 = por %p1322_p2, %p1321_p1 }
   0x9   :  { %p1324_p4 = pnand %p1323_p3, %p1317_p0 }
   0xb   :  { %1327 = shalt.err (!%p1324_p4)
}
   0xc   :  { %s1395_s24 = smov 128   ;;  %s1396_s25 = smov 8  }
   0xd   :  { %37 = dma.hbm_to_vmem [thread:$0]  %s1630_s2, 512, %s32_s22, [#allocation6], %s1395_s24, %s1395_s24, %s1396_s25  }
   0xe   :  { %s1397_s28 = smov [#allocation2]   ;;  %s1398_s30 = smov [#allocation7]  }
   0xf   :  { %s20_s29 = sshll.u32 %s1397_s28, 4  ;;  %s45_s7 = sshll.u32 %s1398_s30, 4  ;;  %s21_s29 = int_to_ptr.vmem [resolvable:$true] %s20_s29  ;;  %s46_s7 = int_to_ptr.vmem [resolvable:$true] %s45_s7 }
  0x10   :  { %s1336_s8 = scalar_lea.vmem %s21_s29, 128  ;;  %p1341_p6 = scmp.lt.s32.totalorder %s21_s29, %s21_s29 }
  0x11   :  { %p1337_p5 = scmp.ne.s32.totalorder %s21_s29, %s1336_s8  ;;  %p1342_p7 = scmp.lt.s32.totalorder %s1336_s8, %s1336_s8 }
  0x13   :  { %p1343_p8 = por %p1342_p7, %p1341_p6 }
  0x15   :  { %p1344_p9 = pnand %p1343_p8, %p1337_p5 }
  0x17   :  { %1347 = shalt.err (!%p1344_p9)
}
  0x18   :  { %23 = dma.hbm_to_vmem [thread:$0]  %s1628_s0, 128, %s21_s29, [#allocation3]  }
  0x19   :  { %s1356_s11 = scalar_lea.vmem %s46_s7, 512  ;;  %p1361_p11 = scmp.lt.s32.totalorder %s46_s7, %s46_s7 }
  0x1a   :  { %p1357_p10 = scmp.ne.s32.totalorder %s46_s7, %s1356_s11  ;;  %p1362_p12 = scmp.lt.s32.totalorder %s1356_s11, %s1356_s11 }
  0x1c   :  { %p1363_p13 = por %p1362_p12, %p1361_p11 }
  0x1e   :  { %p1364_p0 = pnand %p1363_p13, %p1357_p10 }
  0x20   :  { %1367 = shalt.err (!%p1364_p0)
}
  0x21   :  { %51 = dma.hbm_to_vmem [thread:$0]  %s1632_s4, 512, %s46_s7, [#allocation6], %s1395_s24, %s1395_s24, %s1396_s25  }
  0x22   :  { %1388 = dma.done.wait [#allocation3], 128  }
  0x23   :  { %1389 = vsyncadd [#allocation3], 4294967168 }
  0x24   :  { %1390 = dma.done.wait [#allocation6], 1024  }
  0x25   :  { %1391 = vsyncadd [#allocation6], 4294966272  ;;  %v1399_v0 = vmov 0.0   ;;  %vm1400_vm0 = vmmov 0   ;;  %v67_v1 = vld [vmem:[#allocation2] sm:$0xff]  ;;  %v1457_v3 = vld [vmem:[#allocation5 + $0x10] sm:$0xff]  ;;  %v100_v6 = vlaneseq }
  0x26   :  { %1130 = vmatprep.subr.mxu0 %v1399_v0  ;;  %1138 = vmatprep.mubr.msk.f32.mxu0 %vm1400_vm0, %v1399_v0  ;;  %v1455_v2 = vld [vmem:[#allocation5 + $0x18] sm:$0xff]  ;;  %v1461_v4 = vld [vmem:[#allocation5 + $0x8] sm:$0xff]  ;;  %v1467_v5 = vld [vmem:[#allocation5] sm:$0xff]  ;;  %s1401_s15 = smov 96   ;;  %vm186_vm1 = vcmask 261120   ;;  %s1404_s18 = smov [#allocation8]  }
  0x27   :  { %1141 = vmatprep.subr.mxu1 %v1399_v0  ;;  %1149 = vmatprep.mubr.msk.f32.mxu1 %vm1400_vm0, %v1399_v0  ;;  %v1490_v7 = vshrl.u32 %v100_v6, 7  ;;  %v1499_v13 = vld [vmem:[%s1629_s1] ss:$0 sm:$0xff]  ;;  %s1402_s1 = smov 64   ;;  %s1056_s19 = sshll.u32 %s1404_s18, 4  ;;  %s1057_s19 = int_to_ptr.vmem [resolvable:$true] %s1056_s19 }
  0x28   :  { %68 = vxpose.xlu0.b32.start.end [1/1] (short) (narrow) %v67_v1, 8  ;;  %1131 = vmatpush3.msra.mxu0 %v1455_v2  ;;  %v1504_v15 = vld [vmem:[%s1631_s3] ss:$0 sm:$0xff]  ;;  %s1403_s3 = smov 32   ;;  %s1368_s20 = scalar_lea.vmem %s1057_s19, 128 }
  0x29   :  { %1132 = vmatprep.subr.mxu0 %v1399_v0  ;;  %1142 = vmatpush3.msra.mxu1 %v1455_v2  ;;  %v102_v8 = vsub.s32 0, %v1490_v7  ;;  %v109_v24 = vsub.s32 1, %v1490_v7  ;;  %v116_v44 = vsub.s32 2, %v1490_v7  ;;  %v123_v6 = vsub.s32 3, %v1490_v7  ;;  %p1369_p1 = scmp.ne.s32.totalorder %s1057_s19, %s1368_s20  ;;  %p1373_p2 = scmp.lt.s32.totalorder %s1057_s19, %s1057_s19 }
  0x2a   :  { %1133 = vmatpush3.msra.mxu0 %v1457_v3  ;;  %1143 = vmatprep.subr.mxu1 %v1399_v0  ;;  %p1374_p3 = scmp.lt.s32.totalorder %s1368_s20, %s1368_s20 }
  0x2b   :  { %1134 = vmatprep.subr.mxu0 %v1399_v0  ;;  %1144 = vmatpush3.msra.mxu1 %v1457_v3 }
  0x2c   :  { %1135 = vmatpush3.msra.mxu0 %v1461_v4  ;;  %1145 = vmatprep.subr.mxu1 %v1399_v0  ;;  %p1375_p4 = por %p1374_p3, %p1373_p2 }
  0x2d   :  { %1136 = vmatprep.subr.mxu0 %v1399_v0  ;;  %1146 = vmatpush3.msra.mxu1 %v1461_v4 }
  0x2e   :  { %1137 = vmatpush3.msra.mxu0 %v1467_v5  ;;  %1147 = vmatprep.subr.mxu1 %v1399_v0  ;;  %p1376_p5 = pnand %p1375_p4, %p1369_p1 }
  0x2f   :  { %1139 = vmatmul.mubr.f32.vlgmr.msra.gmra.mxu0 %v1399_v0  ;;  %1148 = vmatpush3.msra.mxu1 %v1467_v5 }
  0x30   :  { %1152 = vmatprep.subr.mxu0 %v1399_v0  ;;  %1160 = vmatprep.mubr.msk.f32.mxu0 %vm1400_vm0, %v1399_v0 }
  0x31   :  { %1153 = vmatpush3.msra.mxu0 %v1455_v2  ;;  %1163 = vmatprep.subr.mxu1 %v1399_v0 }
  0x32   :  { %1154 = vmatprep.subr.mxu0 %v1399_v0 }
  0x33   :  { %1155 = vmatpush3.msra.mxu0 %v1457_v3 }
  0x34   :  { %1156 = vmatprep.subr.mxu0 %v1399_v0 }
  0x35   :  { %1157 = vmatpush3.msra.mxu0 %v1461_v4 }
  0x36   :  { %1158 = vmatprep.subr.mxu0 %v1399_v0 }
  0x37   :  { %1159 = vmatpush3.msra.mxu0 %v1467_v5 }
  0x38   :  { %1174 = vmatprep.subr.mxu0 %v1399_v0 }
  0xa4   :  { %v1493_v9 = vpop.trf.xlu0 }
  0xa5   :  { %v103_v10 = vrot.slane %v1493_v9, %v102_v8  ;;  %v110_v25 = vrot.slane %v1493_v9, %v109_v24  ;;  %v117_v45 = vrot.slane %v1493_v9, %v116_v44  ;;  %v124_v8 = vrot.slane %v1493_v9, %v123_v6 }
  0xa7   :  { %105 = vbcast.lane.b32.xlu0 %v103_v10, 256 }
  0xef   :  { %v256_v11 = vpop.f32.mrf.mxu0 }
  0xf1   :  { %v1140_v12 = vpop.f32.mrf.mxu0 }
 0x119   :  { %v106_v14 = vpop.permute.xlu0 %105 }
 0x11a   :  { %v163_v16 = vmul.f32 %v1499_v13, %v106_v14 }
 0x11c   :  { %v178_v17 = vadd.f32 %v1504_v15, %v163_v16 }
 0x11e   :  { %v260_v18 = vadd.f32 %v256_v11, %v178_v17 }
 0x120   :  { %v1068_v19 = vmul.f32 -1.442695, %v260_v18 }
 0x122   :  { %1240 = vpow2.f32 %v1068_v19 }
 0x12f   :  { %v1241_v20 = vpop.eup %1240 }
 0x130   :  { %v265_v21 = vadd.f32 1.0, %v1241_v20 }
 0x132   :  { %1242 = vrcp.f32 %v265_v21 }
 0x133   :  { %1244 = vtanh.f32 %v260_v18 }
 0x13f   :  { %v1243_v22 = vpop.eup %1242 }
 0x140   :  { %269 = vrot.lane.b32.xlu1 %v1243_v22, %s1401_s15  ;;  %v273_v23 = vmul.f32 0.0, %v1243_v22  ;;  %v1245_v27 = vpop.eup %1244 }
 0x144   :  { %275 = vrot.lane.b32.xlu1 %v273_v23, %s1402_s1 }
 0x148   :  { %280 = vrot.lane.b32.xlu1 %v1243_v22, %s1403_s3 }
 0x14c   :  { %112 = vbcast.lane.b32.xlu1 %v110_v25, 256 }
 0x1b2   :  { %v270_v26 = vpop.permute.xlu1 %269 }
 0x1b3   :  { %v272_v28 = vmul.f32 %v1245_v27, %v270_v26 }
 0x1b6   :  { %v276_v29 = vpop.permute.xlu1 %275 }
 0x1b7   :  { %v278_v30 = vadd.f32 %v276_v29, %v272_v28 }
 0x1b9   :  { %1246 = vtanh.f32 %v278_v30 }
 0x1ba   :  { %v281_v32 = vpop.permute.xlu1 %280 }
 0x1be   :  { %v113_v34 = vpop.permute.xlu1 %112 }
 0x1bf   :  { %v164_v35 = vmul.f32 %v1499_v13, %v113_v34 }
 0x1c1   :  { %v179_v36 = vadd.f32 %v1504_v15, %v164_v35 }
 0x1c6   :  { %v1247_v31 = vpop.eup %1246 }
 0x1c7   :  { %v283_v33 = vmul.f32 %v1247_v31, %v281_v32 }
 0x1c9   :  { %1150 = vmatmul.mubr.msk.f32.vlgmr.msra.gmra.mxu1 %vm186_vm1, %v283_v33 }
 0x1ca   :  { %1164 = vmatpush3.msra.mxu1 %v1455_v2  ;;  %1171 = vmatprep.mubr.msk.f32.mxu1 %vm1400_vm0, %v1399_v0 }
 0x1cb   :  { %1165 = vmatprep.subr.mxu1 %v1399_v0 }
 0x1cc   :  { %1166 = vmatpush3.msra.mxu1 %v1457_v3 }
 0x1cd   :  { %1167 = vmatprep.subr.mxu1 %v1399_v0 }
 0x1ce   :  { %1168 = vmatpush3.msra.mxu1 %v1461_v4 }
 0x1cf   :  { %1169 = vmatprep.subr.mxu1 %v1399_v0 }
 0x1d0   :  { %1170 = vmatpush3.msra.mxu1 %v1467_v5 }
 0x1d1   :  { %1185 = vmatprep.subr.mxu1 %v1399_v0 }
 0x289   :  { %v353_v37 = vpop.f32.mrf.mxu1 }
 0x28a   :  { %v357_v38 = vadd.f32 %v353_v37, %v179_v36 }
 0x28b   :  { %v1151_v39 = vpop.f32.mrf.mxu1 }
 0x28c   :  { %v1070_v40 = vmul.f32 -1.442695, %v357_v38 }
 0x28e   :  { %1248 = vpow2.f32 %v1070_v40 }
 0x29b   :  { %v1249_v41 = vpop.eup %1248 }
 0x29c   :  { %v362_v42 = vadd.f32 1.0, %v1249_v41 }
 0x29e   :  { %1250 = vrcp.f32 %v362_v42 }
 0x29f   :  { %1252 = vtanh.f32 %v357_v38 }
 0x2ab   :  { %v1251_v43 = vpop.eup %1250 }
 0x2ac   :  { %366 = vrot.lane.b32.xlu1 %v1251_v43, %s1401_s15  ;;  %v1253_v47 = vpop.eup %1252 }
 0x2b0   :  { %370 = vrot.lane.b32.xlu1 %v1251_v43, %s1402_s1 }
 0x2b4   :  { %376 = vrot.lane.b32.xlu1 %v1251_v43, %s1403_s3 }
 0x2b8   :  { %119 = vbcast.lane.b32.xlu1 %v117_v45, 256 }
 0x31e   :  { %v367_v46 = vpop.permute.xlu1 %366 }
 0x31f   :  { %v369_v49 = vmul.f32 %v1253_v47, %v367_v46 }
 0x322   :  { %v371_v48 = vpop.permute.xlu1 %370 }
 0x323   :  { %v373_v50 = vmul.f32 %v371_v48, %v278_v30  ;;  %v130_v30 = vsub.s32 4, %v1490_v7 }
 0x325   :  { %v374_v51 = vadd.f32 %v373_v50, %v369_v49  ;;  %v131_v32 = vrot.slane %v1493_v9, %v130_v30 }
 0x326   :  { %v377_v53 = vpop.permute.xlu1 %376 }
 0x327   :  { %1254 = vtanh.f32 %v374_v51 }
 0x32a   :  { %v120_v55 = vpop.permute.xlu1 %119 }
 0x32b   :  { %v165_v56 = vmul.f32 %v1499_v13, %v120_v55 }
 0x32d   :  { %v180_v57 = vadd.f32 %v1504_v15, %v165_v56 }
 0x334   :  { %v1255_v52 = vpop.eup %1254 }
 0x335   :  { %v379_v54 = vmul.f32 %v1255_v52, %v377_v53 }
 0x337   :  { %1161 = vmatmul.mubr.msk.f32.vlgmr.msra.gmra.mxu0 %vm186_vm1, %v379_v54 }
 0x338   :  { %1175 = vmatpush3.msra.mxu0 %v1455_v2  ;;  %1182 = vmatprep.mubr.msk.f32.mxu0 %vm1400_vm0, %v1399_v0 }
 0x339   :  { %1176 = vmatprep.subr.mxu0 %v1399_v0 }
 0x33a   :  { %1177 = vmatpush3.msra.mxu0 %v1457_v3 }
 0x33b   :  { %1178 = vmatprep.subr.mxu0 %v1399_v0 }
 0x33c   :  { %1179 = vmatpush3.msra.mxu0 %v1461_v4 }
 0x33d   :  { %1180 = vmatprep.subr.mxu0 %v1399_v0 }
 0x33e   :  { %1181 = vmatpush3.msra.mxu0 %v1467_v5 }
 0x33f   :  { %1196 = vmatprep.subr.mxu0 %v1399_v0 }
 0x3f7   :  { %v449_v58 = vpop.f32.mrf.mxu0 }
 0x3f8   :  { %v453_v59 = vadd.f32 %v449_v58, %v180_v57 }
 0x3f9   :  { %v1162_v60 = vpop.f32.mrf.mxu0 }
 0x3fa   :  { %v1072_v61 = vmul.f32 -1.442695, %v453_v59 }
 0x3fc   :  { %1256 = vpow2.f32 %v1072_v61 }
 0x409   :  { %v1257_v62 = vpop.eup %1256 }
 0x40a   :  { %v458_v63 = vadd.f32 1.0, %v1257_v62 }
 0x40c   :  { %1258 = vrcp.f32 %v458_v63 }
 0x40d   :  { %1260 = vtanh.f32 %v453_v59 }
 0x419   :  { %v1259_v1 = vpop.eup %1258 }
 0x41a   :  { %462 = vrot.lane.b32.xlu1 %v1259_v1, %s1401_s15  ;;  %v1261_v11 = vpop.eup %1260 }
 0x41e   :  { %466 = vrot.lane.b32.xlu1 %v1259_v1, %s1402_s1 }
 0x422   :  { %472 = vrot.lane.b32.xlu1 %v1259_v1, %s1403_s3 }
 0x426   :  { %126 = vbcast.lane.b32.xlu1 %v124_v8, 256 }
 0x48c   :  { %v463_v10 = vpop.permute.xlu1 %462 }
 0x48d   :  { %v465_v14 = vmul.f32 %v1261_v11, %v463_v10 }
 0x490   :  { %v467_v12 = vpop.permute.xlu1 %466 }
 0x491   :  { %v469_v16 = vmul.f32 %v467_v12, %v374_v51  ;;  %v137_v51 = vsub.s32 5, %v1490_v7 }
 0x493   :  { %v470_v17 = vadd.f32 %v469_v16, %v465_v14  ;;  %v138_v53 = vrot.slane %v1493_v9, %v137_v51  ;;  %v144_v14 = vsub.s32 6, %v1490_v7 }
 0x494   :  { %v473_v19 = vpop.permute.xlu1 %472 }
 0x495   :  { %1262 = vtanh.f32 %v470_v17 }
 0x498   :  { %v127_v21 = vpop.permute.xlu1 %126 }
 0x499   :  { %v166_v22 = vmul.f32 %v1499_v13, %v127_v21 }
 0x49b   :  { %v181_v23 = vadd.f32 %v1504_v15, %v166_v22 }
 0x4a2   :  { %v1263_v18 = vpop.eup %1262 }
 0x4a3   :  { %v475_v20 = vmul.f32 %v1263_v18, %v473_v19 }
 0x4a5   :  { %1172 = vmatmul.mubr.msk.f32.vlgmr.msra.gmra.mxu1 %vm186_vm1, %v475_v20 }
 0x4a6   :  { %1186 = vmatpush3.msra.mxu1 %v1455_v2  ;;  %1193 = vmatprep.mubr.msk.f32.mxu1 %vm1400_vm0, %v1399_v0 }
 0x4a7   :  { %1187 = vmatprep.subr.mxu1 %v1399_v0 }
 0x4a8   :  { %1188 = vmatpush3.msra.mxu1 %v1457_v3 }
 0x4a9   :  { %1189 = vmatprep.subr.mxu1 %v1399_v0 }
 0x4aa   :  { %1190 = vmatpush3.msra.mxu1 %v1461_v4 }
 0x4ab   :  { %1191 = vmatprep.subr.mxu1 %v1399_v0 }
 0x4ac   :  { %1192 = vmatpush3.msra.mxu1 %v1467_v5 }
 0x4ad   :  { %1207 = vmatprep.subr.mxu1 %v1399_v0 }
 0x565   :  { %v545_v24 = vpop.f32.mrf.mxu1 }
 0x566   :  { %v549_v25 = vadd.f32 %v545_v24, %v181_v23 }
 0x567   :  { %v1173_v26 = vpop.f32.mrf.mxu1 }
 0x568   :  { %v1074_v27 = vmul.f32 -1.442695, %v549_v25 }
 0x56a   :  { %1264 = vpow2.f32 %v1074_v27 }
 0x577   :  { %v1265_v28 = vpop.eup %1264 }
 0x578   :  { %v554_v29 = vadd.f32 1.0, %v1265_v28 }
 0x57a   :  { %1266 = vrcp.f32 %v554_v29 }
 0x57b   :  { %1268 = vtanh.f32 %v549_v25 }
 0x587   :  { %v1267_v31 = vpop.eup %1266 }
 0x588   :  { %562 = vrot.lane.b32.xlu1 %v1267_v31, %s1402_s1  ;;  %558 = vrot.lane.b32.xlu0 %v1267_v31, %s1401_s15  ;;  %v1269_v33 = vpop.eup %1268 }
 0x58c   :  { %133 = vbcast.lane.b32.xlu1 %v131_v32, 256  ;;  %568 = vrot.lane.b32.xlu0 %v1267_v31, %s1403_s3 }
 0x5fa   :  { %v563_v34 = vpop.permute.xlu1 %562  ;;  %v559_v35 = vpop.permute.xlu0 %558 }
 0x5fb   :  { %v565_v36 = vmul.f32 %v563_v34, %v470_v17  ;;  %v561_v37 = vmul.f32 %v1269_v33, %v559_v35  ;;  %v151_v34 = vsub.s32 7, %v1490_v7 }
 0x5fd   :  { %v566_v38 = vadd.f32 %v565_v36, %v561_v37  ;;  %v152_v36 = vrot.slane %v1493_v9, %v151_v34 }
 0x5fe   :  { %v569_v40 = vpop.permute.xlu0 %568  ;;  %v134_v42 = vpop.permute.xlu1 %133 }
 0x5ff   :  { %1270 = vtanh.f32 %v566_v38  ;;  %v167_v43 = vmul.f32 %v1499_v13, %v134_v42 }
 0x601   :  { %v182_v44 = vadd.f32 %v1504_v15, %v167_v43 }
 0x60c   :  { %v1271_v39 = vpop.eup %1270 }
 0x60d   :  { %v571_v41 = vmul.f32 %v1271_v39, %v569_v40 }
 0x60f   :  { %1183 = vmatmul.mubr.msk.f32.vlgmr.msra.gmra.mxu0 %vm186_vm1, %v571_v41 }
 0x610   :  { %1197 = vmatpush3.msra.mxu0 %v1455_v2  ;;  %1204 = vmatprep.mubr.msk.f32.mxu0 %vm1400_vm0, %v1399_v0 }
 0x611   :  { %1198 = vmatprep.subr.mxu0 %v1399_v0 }
 0x612   :  { %1199 = vmatpush3.msra.mxu0 %v1457_v3 }
 0x613   :  { %1200 = vmatprep.subr.mxu0 %v1399_v0 }
 0x614   :  { %1201 = vmatpush3.msra.mxu0 %v1461_v4 }
 0x615   :  { %1202 = vmatprep.subr.mxu0 %v1399_v0 }
 0x616   :  { %1203 = vmatpush3.msra.mxu0 %v1467_v5 }
 0x617   :  { %1218 = vmatprep.subr.mxu0 %v1399_v0 }
 0x6cf   :  { %v641_v45 = vpop.f32.mrf.mxu0 }
 0x6d0   :  { %v645_v46 = vadd.f32 %v641_v45, %v182_v44 }
 0x6d1   :  { %v1184_v47 = vpop.f32.mrf.mxu0 }
 0x6d2   :  { %v1076_v48 = vmul.f32 -1.442695, %v645_v46 }
 0x6d4   :  { %1272 = vpow2.f32 %v1076_v48 }
 0x6e1   :  { %v1273_v49 = vpop.eup %1272 }
 0x6e2   :  { %v650_v50 = vadd.f32 1.0, %v1273_v49 }
 0x6e4   :  { %1274 = vrcp.f32 %v650_v50 }
 0x6e5   :  { %1276 = vtanh.f32 %v645_v46 }
 0x6f1   :  { %v1275_v52 = vpop.eup %1274 }
 0x6f2   :  { %658 = vrot.lane.b32.xlu1 %v1275_v52, %s1402_s1  ;;  %654 = vrot.lane.b32.xlu0 %v1275_v52, %s1401_s15  ;;  %v1277_v54 = vpop.eup %1276 }
 0x6f6   :  { %140 = vbcast.lane.b32.xlu1 %v138_v53, 256  ;;  %664 = vrot.lane.b32.xlu0 %v1275_v52, %s1403_s3 }
 0x764   :  { %v659_v55 = vpop.permute.xlu1 %658  ;;  %v655_v56 = vpop.permute.xlu0 %654 }
 0x765   :  { %v661_v57 = vmul.f32 %v659_v55, %v566_v38  ;;  %v657_v58 = vmul.f32 %v1277_v54, %v655_v56  ;;  %v959_v54 = vld [vmem:[#allocation7 + $0x18] sm:$0xff]  ;;  %v956_v55 = vld [vmem:[#allocation7] sm:$0xff] }
 0x767   :  { %v662_v59 = vadd.f32 %v661_v57, %v657_v58 }
 0x768   :  { %v665_v61 = vpop.permute.xlu0 %664  ;;  %v141_v63 = vpop.permute.xlu1 %140 }
 0x769   :  { %1278 = vtanh.f32 %v662_v59  ;;  %v168_v1 = vmul.f32 %v1499_v13, %v141_v63 }
 0x776   :  { %v1279_v60 = vpop.eup %1278 }
 0x777   :  { %v667_v62 = vmul.f32 %v1279_v60, %v665_v61 }
 0x779   :  { %1194 = vmatmul.mubr.msk.f32.vlgmr.msra.gmra.mxu1 %vm186_vm1, %v667_v62 }
 0x77a   :  { %1208 = vmatpush3.msra.mxu1 %v1455_v2  ;;  %1215 = vmatprep.mubr.msk.f32.mxu1 %vm1400_vm0, %v1399_v0  ;;  %v183_v2 = vadd.f32 %v1504_v15, %v168_v1 }
 0x77b   :  { %1209 = vmatprep.subr.mxu1 %v1399_v0 }
 0x77c   :  { %1210 = vmatpush3.msra.mxu1 %v1457_v3 }
 0x77d   :  { %1211 = vmatprep.subr.mxu1 %v1399_v0 }
 0x77e   :  { %1212 = vmatpush3.msra.mxu1 %v1461_v4 }
 0x77f   :  { %1213 = vmatprep.subr.mxu1 %v1399_v0 }
 0x780   :  { %1214 = vmatpush3.msra.mxu1 %v1467_v5  ;;  %v145_v5 = vrot.slane %v1493_v9, %v144_v14 }
 0x839   :  { %v737_v6 = vpop.f32.mrf.mxu1 }
 0x83a   :  { %v741_v8 = vadd.f32 %v737_v6, %v183_v2  ;;  %v1083_v2 = vld [vmem:[%s1633_s5] ss:$0 sm:$0xff] }
 0x83b   :  { %v1195_v10 = vpop.f32.mrf.mxu1 }
 0x83c   :  { %v1078_v11 = vmul.f32 -1.442695, %v741_v8 }
 0x83e   :  { %1280 = vpow2.f32 %v1078_v11 }
 0x84b   :  { %v1281_v12 = vpop.eup %1280 }
 0x84c   :  { %v746_v3 = vadd.f32 1.0, %v1281_v12 }
 0x84e   :  { %1282 = vrcp.f32 %v746_v3 }
 0x84f   :  { %1284 = vtanh.f32 %v741_v8 }
 0x85b   :  { %v1283_v4 = vpop.eup %1282 }
 0x85c   :  { %754 = vrot.lane.b32.xlu1 %v1283_v4, %s1402_s1  ;;  %750 = vrot.lane.b32.xlu0 %v1283_v4, %s1401_s15  ;;  %v1285_v16 = vpop.eup %1284 }
 0x860   :  { %147 = vbcast.lane.b32.xlu1 %v145_v5, 256  ;;  %760 = vrot.lane.b32.xlu0 %v1283_v4, %s1403_s3 }
 0x8ce   :  { %v755_v17 = vpop.permute.xlu1 %754  ;;  %v751_v18 = vpop.permute.xlu0 %750 }
 0x8cf   :  { %v757_v19 = vmul.f32 %v755_v17, %v662_v59  ;;  %v753_v20 = vmul.f32 %v1285_v16, %v751_v18 }
 0x8d1   :  { %v758_v21 = vadd.f32 %v757_v19, %v753_v20 }
 0x8d2   :  { %v761_v23 = vpop.permute.xlu0 %760  ;;  %v148_v25 = vpop.permute.xlu1 %147 }
 0x8d3   :  { %1286 = vtanh.f32 %v758_v21  ;;  %v169_v26 = vmul.f32 %v1499_v13, %v148_v25 }
 0x8d5   :  { %v184_v27 = vadd.f32 %v1504_v15, %v169_v26 }
 0x8e0   :  { %v1287_v22 = vpop.eup %1286 }
 0x8e1   :  { %v763_v24 = vmul.f32 %v1287_v22, %v761_v23 }
 0x8e3   :  { %1205 = vmatmul.mubr.msk.f32.vlgmr.msra.gmra.mxu0 %vm186_vm1, %v763_v24 }
 0x8e4   :  { %1226 = vmatprep.mubr.msk.f32.mxu0 %vm1400_vm0, %v1399_v0  ;;  %1219 = vmatpush3.msra.mxu0 %v959_v54 }
 0x8e5   :  { %1220 = vmatprep.subr.mxu0 %v1399_v0 }
 0x9a3   :  { %v833_v28 = vpop.f32.mrf.mxu0 }
 0x9a4   :  { %v837_v29 = vadd.f32 %v833_v28, %v184_v27 }
 0x9a5   :  { %v1206_v30 = vpop.f32.mrf.mxu0 }
 0x9a6   :  { %v1080_v31 = vmul.f32 -1.442695, %v837_v29 }
 0x9a8   :  { %1288 = vpow2.f32 %v1080_v31 }
 0x9b5   :  { %v1289_v32 = vpop.eup %1288 }
 0x9b6   :  { %v842_v33 = vadd.f32 1.0, %v1289_v32 }
 0x9b8   :  { %1290 = vrcp.f32 %v842_v33 }
 0x9b9   :  { %1292 = vtanh.f32 %v837_v29 }
 0x9c5   :  { %v1291_v35 = vpop.eup %1290 }
 0x9c6   :  { %850 = vrot.lane.b32.xlu1 %v1291_v35, %s1402_s1  ;;  %846 = vrot.lane.b32.xlu0 %v1291_v35, %s1401_s15  ;;  %v1293_v37 = vpop.eup %1292 }
 0x9ca   :  { %154 = vbcast.lane.b32.xlu1 %v152_v36, 256  ;;  %856 = vrot.lane.b32.xlu0 %v1291_v35, %s1403_s3 }
 0xa38   :  { %v851_v38 = vpop.permute.xlu1 %850  ;;  %v847_v39 = vpop.permute.xlu0 %846 }
 0xa39   :  { %v853_v40 = vmul.f32 %v851_v38, %v758_v21  ;;  %v849_v41 = vmul.f32 %v1293_v37, %v847_v39 }
 0xa3b   :  { %v854_v42 = vadd.f32 %v853_v40, %v849_v41 }
 0xa3c   :  { %v857_v7 = vpop.permute.xlu0 %856  ;;  %v155_v45 = vpop.permute.xlu1 %154 }
 0xa3d   :  { %1294 = vtanh.f32 %v854_v42  ;;  %v170_v46 = vmul.f32 %v1499_v13, %v155_v45  ;;  %v958_v13 = vld [vmem:[#allocation7 + $0x10] sm:$0xff] }
 0xa3e   :  { %1221 = vmatpush3.msra.mxu0 %v958_v13 }
 0xa3f   :  { %v185_v9 = vadd.f32 %v1504_v15, %v170_v46  ;;  %1222 = vmatprep.subr.mxu0 %v1399_v0  ;;  %v957_v15 = vld [vmem:[#allocation7 + $0x8] sm:$0xff] }
 0xa40   :  { %1223 = vmatpush3.msra.mxu0 %v957_v15 }
 0xa41   :  { %1224 = vmatprep.subr.mxu0 %v1399_v0 }
 0xa42   :  { %1225 = vmatpush3.msra.mxu0 %v956_v55 }
 0xa4a   :  { %v1295_v43 = vpop.eup %1294 }
 0xa4b   :  { %v859_v44 = vmul.f32 %v1295_v43, %v857_v7 }
 0xa4d   :  { %1216 = vmatmul.mubr.msk.f32.vlgmr.msra.gmra.mxu1 %vm186_vm1, %v859_v44 }
 0xb0d   :  { %v929_v47 = vpop.f32.mrf.mxu1 }
 0xb0e   :  { %v933_v48 = vadd.f32 %v929_v47, %v185_v9 }
 0xb0f   :  { %v1217_v49 = vpop.f32.mrf.mxu1 }
 0xb10   :  { %v1082_v50 = vmul.f32 -1.442695, %v933_v48 }
 0xb12   :  { %1296 = vpow2.f32 %v1082_v50 }
 0xb1f   :  { %v1297_v51 = vpop.eup %1296 }
 0xb20   :  { %v938_v52 = vadd.f32 1.0, %v1297_v51 }
 0xb22   :  { %1298 = vrcp.f32 %v938_v52 }
 0xb23   :  { %1300 = vtanh.f32 %v933_v48 }
 0xb2f   :  { %v1299_v53 = vpop.eup %1298 }
 0xb30   :  { %946 = vrot.lane.b32.xlu1 %v1299_v53, %s1402_s1  ;;  %942 = vrot.lane.b32.xlu0 %v1299_v53, %s1401_s15  ;;  %v1301_v56 = vpop.eup %1300 }
 0xb34   :  { %952 = vrot.lane.b32.xlu0 %v1299_v53, %s1403_s3 }
 0xba2   :  { %v947_v57 = vpop.permute.xlu1 %946  ;;  %v943_v58 = vpop.permute.xlu0 %942 }
 0xba3   :  { %v949_v59 = vmul.f32 %v947_v57, %v854_v42  ;;  %v945_v60 = vmul.f32 %v1301_v56, %v943_v58 }
 0xba5   :  { %v950_v61 = vadd.f32 %v949_v59, %v945_v60 }
 0xba6   :  { %v953_v63 = vpop.permute.xlu0 %952 }
 0xba7   :  { %1302 = vtanh.f32 %v950_v61 }
 0xbb4   :  { %v1303_v62 = vpop.eup %1302 }
 0xbb5   :  { %v955_v1 = vmul.f32 %v1303_v62, %v953_v63 }
 0xbb7   :  { %1227 = vmatmul.mubr.msk.f32.vlgmr.msra.gmra.mxu0 %vm186_vm1, %v955_v1 }
 0xc77   :  { %v1036_v6 = vpop.f32.mrf.mxu0 }
 0xc78   :  { %v1037_v0 = vadd.f32 %v1083_v2, %v1036_v6 }
 0xc79   :  { %v1228_v8 = vpop.f32.mrf.mxu0 }
 0xc7a   :  { %1040 = vmax.xlane.f32.xlu1 %v1037_v0 }
 0xd03   :  { %v1041_v10 = vpop.xlane.xlu1 %1040 }
 0xd04   :  { %v1042_v11 = vsub.f32 %v1037_v0, %v1041_v10 }
 0xd06   :  { %v1043_v12 = vmul.f32 1.442695, %v1042_v11 }
 0xd08   :  { %1304 = vpow2.f32 %v1043_v12 }
 0xd15   :  { %v1305_v3 = vpop.eup %1304 }
 0xd16   :  { %1045 = vadd.xlane.f32.xlu0 %v1305_v3 }
 0xd9f   :  { %v1046_v14 = vpop.xlane.xlu0 %1045 }
 0xda0   :  { %1306 = vrcp.f32 %v1046_v14 }
 0xdad   :  { %v1307_v4 = vpop.eup %1306 }
 0xdae   :  { %v1048_v5 = vmul.f32 %v1307_v4, %v1305_v3 }
 0xdb0   :  { %1049 = vst [vmem:[#allocation8] sm:$0xff] %v1048_v5 }
 0xdb1   :  { %1379 = shalt.err (!%p1376_p5)
}
 0xdb2   :  { %1059 = dma.vmem_to_hbm [thread:$0]  %s1057_s19, 128, %s1634_s6, [#allocation4]  }
 0xdb3   :  { %1392 = dma.done.wait [#allocation4], 128  }
 0xdb4   :  { %1393 = vsyncadd [#allocation4], 4294967168 }
 0xdb5   :  { %1063 = vsyncpa [#allocation3], 1 }
 0xdb6   :  { %1064 = vsyncpa [#allocation6], 1 }
 0xdb7   :  { %1065 = vsyncpa [#allocation4], 1 }

</bundles_post_ra>
